<compile_context>
chip_gen: v7x
topology: tpu7x:2x2x1
jax: 0.10.0
libtpu: 0.0.40
codegen_flags: <defaults>
</compile_context>

<pallas_src>
import numpy as np
import jax
import jax.numpy as jnp
from jax import lax
from jax.experimental import pallas as pl
from jax.experimental.pallas import tpu as pltpu

# Static problem sizes (toy backbone).
N_BATCH = 2
H = W = 16            # input spatial
CIN = 4               # input channels
C1 = 8                # conv1 output channels
C2 = 16               # conv2 output channels
NUM_CLASSES = 10
H2 = W2 = H // 2      # spatial after 2x2 maxpool
LANES = 128
K1 = (W + 2) * CIN    # 72: conv1 contraction dim (padded cols x Cin)
K2 = W2 * C1          # 64: conv2 contraction dim (border folded into weights)
HP = H + 2            # 18 padded input rows per image
PP = H2 + 2           # 10 pooled + vertical-border rows per image


def _dot(a, b):
    return jnp.dot(a, b, preferred_element_type=jnp.float32)


# ---------------------------------------------------------------------------
# The fused kernel (one invocation == whole batch)
# ---------------------------------------------------------------------------
def deepdream_kernel(x_ref, w1_ref, w2_ref, wg_ref, bias_ref, o_ref):
    # x_ref  : [N*18, 72]   spatially padded rows of all images, stacked;
    #                       lanes = (padded col, cin).
    # w1_ref : [3, 72, 128] conv1 row-matmul weight per row-tap di (dj folded;
    #                       even output cols -> lanes [0,64), odd -> [64,128)).
    # w2_ref : [3, 64, 128] conv2 row-matmul weight per row-tap di (dj + column
    #                       border folded in).
    # wg_ref : [128, 128]   GAP(1/64) folded into the classifier weights.
    # bias_ref:[8, 128]     row0 = b1 tiled, row1 = b2 tiled, row2 = bfc padded.
    # o_ref  : [N, 128]     padded logits.
    n = x_ref.shape[0] // HP
    m1 = n * HP - 2           # conv1 result rows (valid rows + junk at image seams)
    m2 = n * PP - 2           # conv2 result rows

    # ---- conv1 (+bias+ReLU): 3 shift-and-matmul taps over the stacked batch --
    acc1 = _dot(x_ref[0:m1, :], w1_ref[0])
    acc1 = acc1 + _dot(x_ref[1:m1 + 1, :], w1_ref[1])
    acc1 = acc1 + _dot(x_ref[2:m1 + 2, :], w1_ref[2])
    g = jnp.maximum(acc1 + bias_ref[0:1, :], 0.0)               # [m1, 128]

    # ---- 2x2 maxpool, W direction: even/odd output cols live in lane halves --
    gw = jnp.maximum(g[:, :LANES // 2], g[:, LANES // 2:])      # [m1, 64]

    # ---- H-direction pool + conv2 vertical zero border via selection matmuls -
    # p2 row layout per image k: [zero, pooled rows 0..7, zero]; zero rows come
    # from all-zero selection rows (gw >= 0 so max(0,0)=0 is exact).
    rr = lax.broadcasted_iota(jnp.int32, (n * PP, m1), 0)
    cc = lax.broadcasted_iota(jnp.int32, (n * PP, m1), 1)
    se = jnp.zeros((n * PP, m1), jnp.float32)
    so = jnp.zeros((n * PP, m1), jnp.float32)
    for k in range(n):                       # static python loop (n is static)
        r0 = k * PP + 1                      # first pooled row of image k in p2
        c0 = k * HP                          # first conv1 row of image k in gw
        sel = (rr >= r0) & (rr < r0 + H2)
        tgt = c0 + 2 * (rr - r0)
        se = se + jnp.where(sel & (cc == tgt), 1.0, 0.0)
        so = so + jnp.where(sel & (cc == tgt + 1), 1.0, 0.0)
    p2 = jnp.maximum(_dot(se, gw), _dot(so, gw))                # [n*PP, 64]

    # ---- conv2 (+bias+ReLU): 3 shift-and-matmul taps -------------------------
    acc2 = _dot(p2[0:m2, :], w2_ref[0])
    acc2 = acc2 + _dot(p2[1:m2 + 1, :], w2_ref[1])
    acc2 = acc2 + _dot(p2[2:m2 + 2, :], w2_ref[2])
    h2 = jnp.maximum(acc2 + bias_ref[1:2, :], 0.0)              # [m2, 128]

    # ---- GAP (selection matmul; 1/64 folded into wg) + classifier ------------
    rg = lax.broadcasted_iota(jnp.int32, (n, m2), 0)
    cg = lax.broadcasted_iota(jnp.int32, (n, m2), 1)
    sg = jnp.zeros((n, m2), jnp.float32)
    for k in range(n):
        sg = sg + jnp.where((rg == k) & (cg >= k * PP) & (cg < k * PP + H2),
                            1.0, 0.0)
    rs = _dot(sg, h2)                                           # [n, 128]
    o_ref[...] = _dot(rs, wg_ref[...]) + bias_ref[2:3, :]       # [n, 128]


# ---------------------------------------------------------------------------
# One-time parameter repacking (layout prep, not per-call compute)
# ---------------------------------------------------------------------------
def prepare_params(params):
    w1 = np.asarray(params["w1"], np.float32)    # [3, 3, CIN, C1] (HWIO)
    w2 = np.asarray(params["w2"], np.float32)    # [3, 3, C1, C2]
    wfc = np.asarray(params["wfc"], np.float32)  # [C2, NUM_CLASSES]
    b1 = np.asarray(params["b1"], np.float32)
    b2 = np.asarray(params["b2"], np.float32)
    bfc = np.asarray(params["bfc"], np.float32)

    # conv1: output column j -> lane block (j%2)*8 + j//2, so the pool's column
    # reduction becomes max(lanes[0:64], lanes[64:128]).
    w1r = np.zeros((3, K1, LANES), np.float32)
    for di in range(3):
        for dj in range(3):
            for j in range(W):
                ci = j + dj                          # padded input column
                blk = (j % 2) * (W // 2) + j // 2    # output lane block
                w1r[di, ci * CIN:(ci + 1) * CIN,
                    blk * C1:(blk + 1) * C1] += w1[di, dj]

    # conv2: output column j -> lanes [j*16, j*16+16); left/right zero border
    # folded in by dropping out-of-range taps (their input is zero anyway).
    w2r = np.zeros((3, K2, LANES), np.float32)
    for di in range(3):
        for dj in range(3):
            for j in range(W2):
                p = j + dj - 1                       # pooled input column
                if 0 <= p < W2:
                    w2r[di, p * C1:(p + 1) * C1,
                        j * C2:(j + 1) * C2] += w2[di, dj]

    # GAP (mean over H2*W2 = 64 positions) folded into the classifier matmul.
    wg = np.zeros((LANES, LANES), np.float32)
    wg[:W2 * C2, :NUM_CLASSES] = np.tile(wfc / float(H2 * W2), (W2, 1))

    # Merged bias / constants operand.
    biases = np.zeros((8, LANES), np.float32)
    biases[0] = np.tile(b1, LANES // C1)
    biases[1] = np.tile(b2, LANES // C2)
    biases[2, :NUM_CLASSES] = bfc

    return {
        "w1r": jnp.asarray(w1r), "w2r": jnp.asarray(w2r),
        "wg": jnp.asarray(wg), "biases": jnp.asarray(biases),
    }


# ---------------------------------------------------------------------------
# Forward pass (== DeepDream.forward == Backbone classifier forward)
# ---------------------------------------------------------------------------
def deepdream_forward(kparams, x_nchw):
    n = x_nchw.shape[0]
    # Minimal layout plumbing: NCHW -> NHWC, spatial zero-pad, flatten to one
    # [N*18, 72] slab (images stacked along rows; lanes = (padded col, cin)).
    # allow_input_fusion lets XLA fuse this chain into the pallas_call operand.
    x = jnp.transpose(x_nchw, (0, 2, 3, 1)).astype(jnp.float32)     # [N,H,W,CIN]
    xp = jnp.pad(x, ((0, 0), (1, 1), (1, 1), (0, 0)))               # [N,18,18,CIN]
    x2d = xp.reshape(n * HP, K1)                                    # [N*18, 72]

    out = pl.pallas_call(
        deepdream_kernel,
        out_shape=jax.ShapeDtypeStruct((n, LANES), jnp.float32),
        grid=(1,),
        in_specs=[
            pl.BlockSpec((n * HP, K1), lambda i: (0, 0)),
            pl.BlockSpec((3, K1, LANES), lambda i: (0, 0, 0)),
            pl.BlockSpec((3, K2, LANES), lambda i: (0, 0, 0)),
            pl.BlockSpec((LANES, LANES), lambda i: (0, 0)),
            pl.BlockSpec((8, LANES), lambda i: (0, 0)),
        ],
        out_specs=pl.BlockSpec((n, LANES), lambda i: (0, 0)),
        compiler_params=pltpu.CompilerParams(
            dimension_semantics=("arbitrary",),
            allow_input_fusion=[True, False, False, False, False]),
    )(x2d, kparams["w1r"], kparams["w2r"], kparams["wg"], kparams["biases"])
    return out[:, :NUM_CLASSES]


def init_params(key):
    k = jax.random.split(key, 6)
    return {
        "w1": jax.random.normal(k[0], (3, 3, CIN, C1), jnp.float32) * 0.1,
        "b1": jax.random.normal(k[1], (C1,), jnp.float32) * 0.01,
        "w2": jax.random.normal(k[2], (3, 3, C1, C2), jnp.float32) * 0.1,
        "b2": jax.random.normal(k[3], (C2,), jnp.float32) * 0.01,
        "wfc": jax.random.normal(k[4], (C2, NUM_CLASSES), jnp.float32) * 0.1,
        "bfc": jax.random.normal(k[5], (NUM_CLASSES,), jnp.float32) * 0.01,
    }


# Pure-JAX reference for verification.
def reference_forward(params, x_nchw):
    x = jnp.transpose(x_nchw, (0, 2, 3, 1))
    y = jax.lax.conv_general_dilated(
        x, params["w1"], (1, 1), "SAME",
        dimension_numbers=("NHWC", "HWIO", "NHWC"))
    y = jnp.maximum(y + params["b1"], 0.0)
    y = jax.lax.reduce_window(y, -jnp.inf, jax.lax.max,
                              (1, 2, 2, 1), (1, 2, 2, 1), "VALID")
    y = jax.lax.conv_general_dilated(
        y, params["w2"], (1, 1), "SAME",
        dimension_numbers=("NHWC", "HWIO", "NHWC"))
    y = jnp.maximum(y + params["b2"], 0.0)
    pooled = jnp.mean(y, axis=(1, 2))
    return pooled @ params["wfc"] + params["bfc"]


if __name__ == "__main__":
    key = jax.random.PRNGKey(0)
    kx, kp = jax.random.split(key)
    x = jax.random.normal(kx, (N_BATCH, CIN, H, W), jnp.float32)  # NCHW input
    params = init_params(kp)

    kparams = prepare_params(params)            # one-time weight repacking
    fwd = jax.jit(deepdream_forward)
    out = jax.block_until_ready(fwd(kparams, x))

    ref = reference_forward(params, x)
    assert out.shape == (N_BATCH, NUM_CLASSES), out.shape
    assert jnp.allclose(out, ref, atol=5e-4, rtol=5e-4), (
        "Pallas output does not match reference")
    print("KERNEL_OK")
</pallas_src>

<mosaic_0001>
module attributes {stable_mosaic.version = 11 : i64} {
  func.func @deepdream_kernel(%arg0: i32, %arg1: memref<36x72xf32, #tpu.memory_space<vmem>>, %arg2: memref<3x72x128xf32, #tpu.memory_space<vmem>>, %arg3: memref<3x64x128xf32, #tpu.memory_space<vmem>>, %arg4: memref<128x128xf32, #tpu.memory_space<vmem>>, %arg5: memref<8x128xf32, #tpu.memory_space<vmem>>, %arg6: memref<2x128xf32, #tpu.memory_space<vmem>>) attributes {dimension_semantics = [#tpu.dimension_semantics<arbitrary>], iteration_bounds = array<i64: 1>, scalar_prefetch = 0 : i64, scratch_operands = 0 : i64, tpu.core_type = #tpu.core_type<tc>, window_params = [{pipeline_mode = #tpu.pipeline_mode<synchronous>, transform_indices = @transform_0, window_bounds = array<i64: 36, 72>}, {pipeline_mode = #tpu.pipeline_mode<synchronous>, transform_indices = @transform_1, window_bounds = array<i64: 3, 72, 128>}, {pipeline_mode = #tpu.pipeline_mode<synchronous>, transform_indices = @transform_2, window_bounds = array<i64: 3, 64, 128>}, {pipeline_mode = #tpu.pipeline_mode<synchronous>, transform_indices = @transform_3, window_bounds = array<i64: 128, 128>}, {pipeline_mode = #tpu.pipeline_mode<synchronous>, transform_indices = @transform_4, window_bounds = array<i64: 8, 128>}, {pipeline_mode = #tpu.pipeline_mode<synchronous>, transform_indices = @transform_5, window_bounds = array<i64: 2, 128>}]} {
    %c0 = arith.constant 0 : index
    %c0_0 = arith.constant 0 : index
    %0 = vector.load %arg1[%c0, %c0_0] : memref<36x72xf32, #tpu.memory_space<vmem>>, vector<34x72xf32>
    %c0_1 = arith.constant 0 : index
    %c0_2 = arith.constant 0 : index
    %c0_3 = arith.constant 0 : index
    %1 = vector.load %arg2[%c0_1, %c0_2, %c0_3] : memref<3x72x128xf32, #tpu.memory_space<vmem>>, vector<1x72x128xf32>
    %2 = vector.shape_cast %1 : vector<1x72x128xf32> to vector<72x128xf32>
    %cst = arith.constant dense<0.000000e+00> : vector<34x128xf32>
    %3 = tpu.matmul %0, %2, %cst {dimension_numbers = #tpu.dot_dimension_numbers<[1], [0], [0], [1], [0, 0, 1, 1], [], []>} : vector<34x72xf32>, vector<72x128xf32>, vector<34x128xf32> -> vector<34x128xf32>
    %c1 = arith.constant 1 : index
    %c0_4 = arith.constant 0 : index
    %4 = vector.load %arg1[%c1, %c0_4] : memref<36x72xf32, #tpu.memory_space<vmem>>, vector<34x72xf32>
    %c1_5 = arith.constant 1 : index
    %c0_6 = arith.constant 0 : index
    %c0_7 = arith.constant 0 : index
    %5 = vector.load %arg2[%c1_5, %c0_6, %c0_7] : memref<3x72x128xf32, #tpu.memory_space<vmem>>, vector<1x72x128xf32>
    %6 = vector.shape_cast %5 : vector<1x72x128xf32> to vector<72x128xf32>
    %cst_8 = arith.constant dense<0.000000e+00> : vector<34x128xf32>
    %7 = tpu.matmul %4, %6, %cst_8 {dimension_numbers = #tpu.dot_dimension_numbers<[1], [0], [0], [1], [0, 0, 1, 1], [], []>} : vector<34x72xf32>, vector<72x128xf32>, vector<34x128xf32> -> vector<34x128xf32>
    %8 = arith.addf %3, %7 : vector<34x128xf32>
    %c2 = arith.constant 2 : index
    %c0_9 = arith.constant 0 : index
    %9 = vector.load %arg1[%c2, %c0_9] : memref<36x72xf32, #tpu.memory_space<vmem>>, vector<34x72xf32>
    %c2_10 = arith.constant 2 : index
    %c0_11 = arith.constant 0 : index
    %c0_12 = arith.constant 0 : index
    %10 = vector.load %arg2[%c2_10, %c0_11, %c0_12] : memref<3x72x128xf32, #tpu.memory_space<vmem>>, vector<1x72x128xf32>
    %11 = vector.shape_cast %10 : vector<1x72x128xf32> to vector<72x128xf32>
    %cst_13 = arith.constant dense<0.000000e+00> : vector<34x128xf32>
    %12 = tpu.matmul %9, %11, %cst_13 {dimension_numbers = #tpu.dot_dimension_numbers<[1], [0], [0], [1], [0, 0, 1, 1], [], []>} : vector<34x72xf32>, vector<72x128xf32>, vector<34x128xf32> -> vector<34x128xf32>
    %13 = arith.addf %8, %12 : vector<34x128xf32>
    %c0_14 = arith.constant 0 : index
    %c0_15 = arith.constant 0 : index
    %14 = vector.load %arg5[%c0_14, %c0_15] : memref<8x128xf32, #tpu.memory_space<vmem>>, vector<1x128xf32>
    %15 = vector.broadcast %14 : vector<1x128xf32> to vector<34x128xf32>
    %16 = arith.addf %13, %15 : vector<34x128xf32>
    %cst_16 = arith.constant 0.000000e+00 : f32
    %17 = vector.broadcast %cst_16 : f32 to vector<34x128xf32>
    %18 = arith.maximumf %16, %17 : vector<34x128xf32>
    %19 = vector.extract_strided_slice %18 {offsets = [0, 0], sizes = [34, 64], strides = [1, 1]} : vector<34x128xf32> to vector<34x64xf32>
    %20 = vector.extract_strided_slice %18 {offsets = [0, 64], sizes = [34, 64], strides = [1, 1]} : vector<34x128xf32> to vector<34x64xf32>
    %21 = arith.maximumf %19, %20 : vector<34x64xf32>
    %22 = tpu.iota {dimensions = array<i32: 0>} : vector<20x34xi32>
    %23 = tpu.iota {dimensions = array<i32: 1>} : vector<20x34xi32>
    %cst_17 = arith.constant 0.000000e+00 : f32
    %24 = vector.broadcast %cst_17 : f32 to vector<20x34xf32>
    %cst_18 = arith.constant 0.000000e+00 : f32
    %25 = vector.broadcast %cst_18 : f32 to vector<20x34xf32>
    %c1_i32 = arith.constant 1 : i32
    %26 = vector.broadcast %c1_i32 : i32 to vector<20x34xi32>
    %27 = arith.cmpi sge, %22, %26 : vector<20x34xi32>
    %c9_i32 = arith.constant 9 : i32
    %28 = vector.broadcast %c9_i32 : i32 to vector<20x34xi32>
    %29 = arith.cmpi slt, %22, %28 : vector<20x34xi32>
    %30 = arith.andi %27, %29 : vector<20x34xi1>
    %c1_i32_19 = arith.constant 1 : i32
    %31 = vector.broadcast %c1_i32_19 : i32 to vector<20x34xi32>
    %32 = arith.subi %22, %31 : vector<20x34xi32>
    %c2_i32 = arith.constant 2 : i32
    %33 = vector.broadcast %c2_i32 : i32 to vector<20x34xi32>
    %34 = arith.muli %33, %32 : vector<20x34xi32>
    %c0_i32 = arith.constant 0 : i32
    %35 = vector.broadcast %c0_i32 : i32 to vector<20x34xi32>
    %36 = arith.addi %35, %34 : vector<20x34xi32>
    %37 = arith.cmpi eq, %23, %36 : vector<20x34xi32>
    %38 = arith.andi %30, %37 : vector<20x34xi1>
    %cst_20 = arith.constant 1.000000e+00 : f32
    %cst_21 = arith.constant 0.000000e+00 : f32
    %39 = vector.broadcast %cst_20 : f32 to vector<20x34xf32>
    %40 = vector.broadcast %cst_21 : f32 to vector<20x34xf32>
    %41 = arith.select %38, %39, %40 : vector<20x34xi1>, vector<20x34xf32>
    %42 = arith.addf %24, %41 : vector<20x34xf32>
    %c1_i32_22 = arith.constant 1 : i32
    %43 = vector.broadcast %c1_i32_22 : i32 to vector<20x34xi32>
    %44 = arith.addi %36, %43 : vector<20x34xi32>
    %45 = arith.cmpi eq, %23, %44 : vector<20x34xi32>
    %46 = arith.andi %30, %45 : vector<20x34xi1>
    %cst_23 = arith.constant 1.000000e+00 : f32
    %cst_24 = arith.constant 0.000000e+00 : f32
    %47 = vector.broadcast %cst_23 : f32 to vector<20x34xf32>
    %48 = vector.broadcast %cst_24 : f32 to vector<20x34xf32>
    %49 = arith.select %46, %47, %48 : vector<20x34xi1>, vector<20x34xf32>
    %50 = arith.addf %25, %49 : vector<20x34xf32>
    %c11_i32 = arith.constant 11 : i32
    %51 = vector.broadcast %c11_i32 : i32 to vector<20x34xi32>
    %52 = arith.cmpi sge, %22, %51 : vector<20x34xi32>
    %c19_i32 = arith.constant 19 : i32
    %53 = vector.broadcast %c19_i32 : i32 to vector<20x34xi32>
    %54 = arith.cmpi slt, %22, %53 : vector<20x34xi32>
    %55 = arith.andi %52, %54 : vector<20x34xi1>
    %c11_i32_25 = arith.constant 11 : i32
    %56 = vector.broadcast %c11_i32_25 : i32 to vector<20x34xi32>
    %57 = arith.subi %22, %56 : vector<20x34xi32>
    %c2_i32_26 = arith.constant 2 : i32
    %58 = vector.broadcast %c2_i32_26 : i32 to vector<20x34xi32>
    %59 = arith.muli %58, %57 : vector<20x34xi32>
    %c18_i32 = arith.constant 18 : i32
    %60 = vector.broadcast %c18_i32 : i32 to vector<20x34xi32>
    %61 = arith.addi %60, %59 : vector<20x34xi32>
    %62 = arith.cmpi eq, %23, %61 : vector<20x34xi32>
    %63 = arith.andi %55, %62 : vector<20x34xi1>
    %cst_27 = arith.constant 1.000000e+00 : f32
    %cst_28 = arith.constant 0.000000e+00 : f32
    %64 = vector.broadcast %cst_27 : f32 to vector<20x34xf32>
    %65 = vector.broadcast %cst_28 : f32 to vector<20x34xf32>
    %66 = arith.select %63, %64, %65 : vector<20x34xi1>, vector<20x34xf32>
    %67 = arith.addf %42, %66 : vector<20x34xf32>
    %c1_i32_29 = arith.constant 1 : i32
    %68 = vector.broadcast %c1_i32_29 : i32 to vector<20x34xi32>
    %69 = arith.addi %61, %68 : vector<20x34xi32>
    %70 = arith.cmpi eq, %23, %69 : vector<20x34xi32>
    %71 = arith.andi %55, %70 : vector<20x34xi1>
    %cst_30 = arith.constant 1.000000e+00 : f32
    %cst_31 = arith.constant 0.000000e+00 : f32
    %72 = vector.broadcast %cst_30 : f32 to vector<20x34xf32>
    %73 = vector.broadcast %cst_31 : f32 to vector<20x34xf32>
    %74 = arith.select %71, %72, %73 : vector<20x34xi1>, vector<20x34xf32>
    %75 = arith.addf %50, %74 : vector<20x34xf32>
    %cst_32 = arith.constant dense<0.000000e+00> : vector<20x64xf32>
    %76 = tpu.matmul %67, %21, %cst_32 {dimension_numbers = #tpu.dot_dimension_numbers<[1], [0], [0], [1], [0, 0, 1, 1], [], []>} : vector<20x34xf32>, vector<34x64xf32>, vector<20x64xf32> -> vector<20x64xf32>
    %cst_33 = arith.constant dense<0.000000e+00> : vector<20x64xf32>
    %77 = tpu.matmul %75, %21, %cst_33 {dimension_numbers = #tpu.dot_dimension_numbers<[1], [0], [0], [1], [0, 0, 1, 1], [], []>} : vector<20x34xf32>, vector<34x64xf32>, vector<20x64xf32> -> vector<20x64xf32>
    %78 = arith.maximumf %76, %77 : vector<20x64xf32>
    %79 = vector.extract_strided_slice %78 {offsets = [0, 0], sizes = [18, 64], strides = [1, 1]} : vector<20x64xf32> to vector<18x64xf32>
    %c0_34 = arith.constant 0 : index
    %c0_35 = arith.constant 0 : index
    %c0_36 = arith.constant 0 : index
    %80 = vector.load %arg3[%c0_34, %c0_35, %c0_36] : memref<3x64x128xf32, #tpu.memory_space<vmem>>, vector<1x64x128xf32>
    %81 = vector.shape_cast %80 : vector<1x64x128xf32> to vector<64x128xf32>
    %cst_37 = arith.constant dense<0.000000e+00> : vector<18x128xf32>
    %82 = tpu.matmul %79, %81, %cst_37 {dimension_numbers = #tpu.dot_dimension_numbers<[1], [0], [0], [1], [0, 0, 1, 1], [], []>} : vector<18x64xf32>, vector<64x128xf32>, vector<18x128xf32> -> vector<18x128xf32>
    %83 = vector.extract_strided_slice %78 {offsets = [1, 0], sizes = [18, 64], strides = [1, 1]} : vector<20x64xf32> to vector<18x64xf32>
    %c1_38 = arith.constant 1 : index
    %c0_39 = arith.constant 0 : index
    %c0_40 = arith.constant 0 : index
    %84 = vector.load %arg3[%c1_38, %c0_39, %c0_40] : memref<3x64x128xf32, #tpu.memory_space<vmem>>, vector<1x64x128xf32>
    %85 = vector.shape_cast %84 : vector<1x64x128xf32> to vector<64x128xf32>
    %cst_41 = arith.constant dense<0.000000e+00> : vector<18x128xf32>
    %86 = tpu.matmul %83, %85, %cst_41 {dimension_numbers = #tpu.dot_dimension_numbers<[1], [0], [0], [1], [0, 0, 1, 1], [], []>} : vector<18x64xf32>, vector<64x128xf32>, vector<18x128xf32> -> vector<18x128xf32>
    %87 = arith.addf %82, %86 : vector<18x128xf32>
    %88 = vector.extract_strided_slice %78 {offsets = [2, 0], sizes = [18, 64], strides = [1, 1]} : vector<20x64xf32> to vector<18x64xf32>
    %c2_42 = arith.constant 2 : index
    %c0_43 = arith.constant 0 : index
    %c0_44 = arith.constant 0 : index
    %89 = vector.load %arg3[%c2_42, %c0_43, %c0_44] : memref<3x64x128xf32, #tpu.memory_space<vmem>>, vector<1x64x128xf32>
    %90 = vector.shape_cast %89 : vector<1x64x128xf32> to vector<64x128xf32>
    %cst_45 = arith.constant dense<0.000000e+00> : vector<18x128xf32>
    %91 = tpu.matmul %88, %90, %cst_45 {dimension_numbers = #tpu.dot_dimension_numbers<[1], [0], [0], [1], [0, 0, 1, 1], [], []>} : vector<18x64xf32>, vector<64x128xf32>, vector<18x128xf32> -> vector<18x128xf32>
    %92 = arith.addf %87, %91 : vector<18x128xf32>
    %c1_46 = arith.constant 1 : index
    %c0_47 = arith.constant 0 : index
    %93 = vector.load %arg5[%c1_46, %c0_47] : memref<8x128xf32, #tpu.memory_space<vmem>>, vector<1x128xf32>
    %94 = vector.broadcast %93 : vector<1x128xf32> to vector<18x128xf32>
    %95 = arith.addf %92, %94 : vector<18x128xf32>
    %cst_48 = arith.constant 0.000000e+00 : f32
    %96 = vector.broadcast %cst_48 : f32 to vector<18x128xf32>
    %97 = arith.maximumf %95, %96 : vector<18x128xf32>
    %98 = tpu.iota {dimensions = array<i32: 0>} : vector<2x18xi32>
    %99 = tpu.iota {dimensions = array<i32: 1>} : vector<2x18xi32>
    %cst_49 = arith.constant 0.000000e+00 : f32
    %100 = vector.broadcast %cst_49 : f32 to vector<2x18xf32>
    %c0_i32_50 = arith.constant 0 : i32
    %101 = vector.broadcast %c0_i32_50 : i32 to vector<2x18xi32>
    %102 = arith.cmpi eq, %98, %101 : vector<2x18xi32>
    %c0_i32_51 = arith.constant 0 : i32
    %103 = vector.broadcast %c0_i32_51 : i32 to vector<2x18xi32>
    %104 = arith.cmpi sge, %99, %103 : vector<2x18xi32>
    %105 = arith.andi %102, %104 : vector<2x18xi1>
    %c8_i32 = arith.constant 8 : i32
    %106 = vector.broadcast %c8_i32 : i32 to vector<2x18xi32>
    %107 = arith.cmpi slt, %99, %106 : vector<2x18xi32>
    %108 = arith.andi %105, %107 : vector<2x18xi1>
    %cst_52 = arith.constant 1.000000e+00 : f32
    %cst_53 = arith.constant 0.000000e+00 : f32
    %109 = vector.broadcast %cst_52 : f32 to vector<2x18xf32>
    %110 = vector.broadcast %cst_53 : f32 to vector<2x18xf32>
    %111 = arith.select %108, %109, %110 : vector<2x18xi1>, vector<2x18xf32>
    %112 = arith.addf %100, %111 : vector<2x18xf32>
    %c1_i32_54 = arith.constant 1 : i32
    %113 = vector.broadcast %c1_i32_54 : i32 to vector<2x18xi32>
    %114 = arith.cmpi eq, %98, %113 : vector<2x18xi32>
    %c10_i32 = arith.constant 10 : i32
    %115 = vector.broadcast %c10_i32 : i32 to vector<2x18xi32>
    %116 = arith.cmpi sge, %99, %115 : vector<2x18xi32>
    %117 = arith.andi %114, %116 : vector<2x18xi1>
    %c18_i32_55 = arith.constant 18 : i32
    %118 = vector.broadcast %c18_i32_55 : i32 to vector<2x18xi32>
    %119 = arith.cmpi slt, %99, %118 : vector<2x18xi32>
    %120 = arith.andi %117, %119 : vector<2x18xi1>
    %cst_56 = arith.constant 1.000000e+00 : f32
    %cst_57 = arith.constant 0.000000e+00 : f32
    %121 = vector.broadcast %cst_56 : f32 to vector<2x18xf32>
    %122 = vector.broadcast %cst_57 : f32 to vector<2x18xf32>
    %123 = arith.select %120, %121, %122 : vector<2x18xi1>, vector<2x18xf32>
    %124 = arith.addf %112, %123 : vector<2x18xf32>
    %cst_58 = arith.constant dense<0.000000e+00> : vector<2x128xf32>
    %125 = tpu.matmul %124, %97, %cst_58 {dimension_numbers = #tpu.dot_dimension_numbers<[1], [0], [0], [1], [0, 0, 1, 1], [], []>} : vector<2x18xf32>, vector<18x128xf32>, vector<2x128xf32> -> vector<2x128xf32>
    %c0_59 = arith.constant 0 : index
    %c0_60 = arith.constant 0 : index
    %126 = vector.load %arg4[%c0_59, %c0_60] : memref<128x128xf32, #tpu.memory_space<vmem>>, vector<128x128xf32>
    %cst_61 = arith.constant dense<0.000000e+00> : vector<2x128xf32>
    %127 = tpu.matmul %125, %126, %cst_61 {dimension_numbers = #tpu.dot_dimension_numbers<[1], [0], [0], [1], [0, 0, 1, 1], [], []>} : vector<2x128xf32>, vector<128x128xf32>, vector<2x128xf32> -> vector<2x128xf32>
    %c2_62 = arith.constant 2 : index
    %c0_63 = arith.constant 0 : index
    %128 = vector.load %arg5[%c2_62, %c0_63] : memref<8x128xf32, #tpu.memory_space<vmem>>, vector<1x128xf32>
    %129 = vector.broadcast %128 : vector<1x128xf32> to vector<2x128xf32>
    %130 = arith.addf %127, %129 : vector<2x128xf32>
    %c0_64 = arith.constant 0 : index
    %c0_65 = arith.constant 0 : index
    %131 = vector.load %arg6[%c0_64, %c0_65] : memref<2x128xf32, #tpu.memory_space<vmem>>, vector<2x128xf32>
    tpu.vector_store %arg6[%c0_64, %c0_65], %130 {strides = array<i32>} : memref<2x128xf32, #tpu.memory_space<vmem>>, vector<2x128xf32>,
    return
  }
  func.func @transform_0(%arg0: i32) -> (i32, i32) {
    %c0_i32 = arith.constant 0 : i32
    %c0_i32_0 = arith.constant 0 : i32
    %c0_i32_1 = arith.constant 0 : i32
    return %c0_i32, %c0_i32_0 : i32, i32
  }
  func.func @transform_1(%arg0: i32) -> (i32, i32, i32) {
    %c0_i32 = arith.constant 0 : i32
    %c0_i32_0 = arith.constant 0 : i32
    %c0_i32_1 = arith.constant 0 : i32
    %c0_i32_2 = arith.constant 0 : i32
    return %c0_i32, %c0_i32_0, %c0_i32_1 : i32, i32, i32
  }
  func.func @transform_2(%arg0: i32) -> (i32, i32, i32) {
    %c0_i32 = arith.constant 0 : i32
    %c0_i32_0 = arith.constant 0 : i32
    %c0_i32_1 = arith.constant 0 : i32
    %c0_i32_2 = arith.constant 0 : i32
    return %c0_i32, %c0_i32_0, %c0_i32_1 : i32, i32, i32
  }
  func.func @transform_3(%arg0: i32) -> (i32, i32) {
    %c0_i32 = arith.constant 0 : i32
    %c0_i32_0 = arith.constant 0 : i32
    %c0_i32_1 = arith.constant 0 : i32
    return %c0_i32, %c0_i32_0 : i32, i32
  }
  func.func @transform_4(%arg0: i32) -> (i32, i32) {
    %c0_i32 = arith.constant 0 : i32
    %c0_i32_0 = arith.constant 0 : i32
    %c0_i32_1 = arith.constant 0 : i32
    return %c0_i32, %c0_i32_0 : i32, i32
  }
  func.func @transform_5(%arg0: i32) -> (i32, i32) {
    %c0_i32 = arith.constant 0 : i32
    %c0_i32_0 = arith.constant 0 : i32
    %c0_i32_1 = arith.constant 0 : i32
    return %c0_i32, %c0_i32_0 : i32, i32
  }
}

</mosaic_0001>

<bundles_post_ra>
// kernel: deepdream_forward.1
= control target key start
LH: loop header
LB: loop body
LE: loop exit
PB: predicated region body
PF: predicated region fallthrough
CT: control target
= control target key end

     0   :  { %v1811_v3 = vmov 0.0|0.0   ;;  %vm1812_vm0 = vmmov 0   ;;  %v1813_v11 = vmov 0.0   ;;  %s2314_s0 = inlined_call_operand.vmem [shape: f32[36,72], index: 0, kind: input, shape index: {}]   ;;  %s2315_s1 = inlined_call_operand.vmem [shape: f32[3,72,128], index: 1, kind: input, shape index: {}]   ;;  %s2316_s2 = inlined_call_operand.vmem [shape: f32[3,64,128], index: 2, kind: input, shape index: {}]   ;;  %s2317_s3 = inlined_call_operand.vmem [shape: f32[128,128], index: 3, kind: input, shape index: {}]   ;;  %s2318_s4 = inlined_call_operand.vmem [shape: f32[8,128], index: 4, kind: input, shape index: {}]   ;;  %s2319_s5 = inlined_call_operand.hbm [shape: f32[2,128], index: 5, kind: output, shape index: {}]  }
   0x1   :  { %v1216_v0 = vld [vmem:[%s2315_s1 + $0x48] sm:$0xff]  ;;  %v1217_v1 = vld [vmem:[%s2315_s1 + $0x50] sm:$0xff]  ;;  %v26_v2 = vld [vmem:[%s2315_s1] sm:$0xff]  ;;  %1661 = vmatprep.subr.bf16.mxu0 %v1811_v3  ;;  %1673 = vmatprep.subr.bf16.mxu1 %v1811_v3 }
   0x2   :  { %v1662_v4 = vpack.c.bf16 %v1217_v1, %v1216_v0  ;;  %v27_v5 = vld [vmem:[%s2315_s1 + $0x8] sm:$0xff]  ;;  %v1218_v6 = vld [vmem:[%s2315_s1 + $0x58] sm:$0xff]  ;;  %v1219_v7 = vld [vmem:[%s2315_s1 + $0x60] sm:$0xff]  ;;  %1423 = vmatprep.mubr.msk.f32.mxu0 %vm1812_vm0, %v1813_v11  ;;  %1456 = vmatprep.mubr.msk.f32.mxu1 %vm1812_vm0, %v1813_v11 }
   0x3   :  { %v1674_v8 = vpack.c.bf16 %v27_v5, %v26_v2  ;;  %v28_v9 = vld [vmem:[%s2315_s1 + $0x10] sm:$0xff]  ;;  %v29_v10 = vld [vmem:[%s2315_s1 + $0x18] sm:$0xff]  ;;  %v1665_v12 = vpack.c.bf16 %v1219_v7, %v1218_v6  ;;  %v1220_v14 = vld [vmem:[%s2315_s1 + $0x68] sm:$0xff] }
   0x4   :  { %1663 = vmatpush3.bf16.msra.mxu0 %v1662_v4  ;;  %v1677_v13 = vpack.c.bf16 %v29_v10, %v28_v9  ;;  %v1221_v15 = vld [vmem:[%s2315_s1 + $0x70] sm:$0xff]  ;;  %v30_v16 = vld [vmem:[%s2315_s1 + $0x20] sm:$0xff]  ;;  %v31_v17 = vld [vmem:[%s2315_s1 + $0x28] sm:$0xff] }
   0x5   :  { %1675 = vmatpush3.bf16.msra.mxu1 %v1674_v8  ;;  %1664 = vmatprep.subr.bf16.mxu0 %v1811_v3  ;;  %v1668_v18 = vpack.c.bf16 %v1221_v15, %v1220_v14  ;;  %v1680_v19 = vpack.c.bf16 %v31_v17, %v30_v16  ;;  %v1222_v20 = vld [vmem:[%s2315_s1 + $0x78] sm:$0xff]  ;;  %v1223_v21 = vld [vmem:[%s2315_s1 + $0x80] sm:$0xff]  ;;  %v32_v22 = vld [vmem:[%s2315_s1 + $0x30] sm:$0xff] }
   0x6   :  { %1676 = vmatprep.subr.bf16.mxu1 %v1811_v3  ;;  %v33_v23 = vld [vmem:[%s2315_s1 + $0x38] sm:$0xff]  ;;  %v1671_v24 = vpack.c.bf16 %v1223_v21, %v1222_v20 }
   0x7   :  { %v1683_v25 = vpack.c.bf16 %v33_v23, %v32_v22 }
   0x8   :  { %1666 = vmatpush3.bf16.msra.mxu0 %v1665_v12 }
   0x9   :  { %1678 = vmatpush3.bf16.msra.mxu1 %v1677_v13  ;;  %1667 = vmatprep.subr.bf16.mxu0 %v1811_v3 }
   0xa   :  { %1679 = vmatprep.subr.bf16.mxu1 %v1811_v3 }
   0xc   :  { %1669 = vmatpush3.bf16.msra.mxu0 %v1668_v18 }
   0xd   :  { %1681 = vmatpush3.bf16.msra.mxu1 %v1680_v19  ;;  %1670 = vmatprep.subr.bf16.mxu0 %v1811_v3 }
   0xe   :  { %1682 = vmatprep.subr.bf16.mxu1 %v1811_v3 }
   0xf   :  { %10 = vsyncpa [#allocation3], 0  ;;  %v1224_v26 = vld [vmem:[%s2315_s1 + $0x88] sm:$0xff]  ;;  %v1235_v27 = vld [vmem:[%s2315_s1 + $0x90] sm:$0xff]  ;;  %vm50_vm1 = vcmask 588800   ;;  %s1814_s27 = smov 64  }
  0x10   :  { %1672 = vmatpush3.bf16.msra.mxu0 %v1671_v24  ;;  %v1236_v28 = vld [vmem:[%s2315_s1 + $0x98] sm:$0xff]  ;;  %v34_v29 = vld [vmem:[%s2315_s1 + $0x40] sm:$0xff]  ;;  %v1238_v34 = vld [vmem:[%s2315_s1 + $0xa8] sm:$0xff]  ;;  %vm529_vm11 = vcmask 1041408   ;;  %vm519_vm12 = vcmask 277504   ;;  %s1815_s28 = smov [#allocation2]  }
  0x11   :  { %1684 = vmatpush3.bf16.msra.mxu1 %v1683_v25  ;;  %1421 = vmatprep.subr.mxu0 %v1813_v11  ;;  %v35_v30 = vld [vmem:[%s2314_s0 + $0x1] sm:$0xff]  ;;  %v1686_v32 = vpack.c.bf16 %v1236_v28, %v1235_v27  ;;  %v36_v35 = vld [vmem:[%s2314_s0 + $0x9] sm:$0xff]  ;;  %v1240_v39 = vld [vmem:[%s2315_s1 + $0xb8] sm:$0xff]  ;;  %s1208_s29 = sshll.u32 %s1815_s28, 4  ;;  %s1209_s29 = int_to_ptr.vmem [resolvable:$true] %s1208_s29 }
  0x12   :  { %1454 = vmatprep.subr.mxu1 %v1813_v11  ;;  %v21_v31 = vld [vmem:[%s2314_s0] sm:$0xff]  ;;  %v22_v36 = vld [vmem:[%s2314_s0 + $0x8] sm:$0xff]  ;;  %v1239_v38 = vld [vmem:[%s2315_s1 + $0xb0] sm:$0xff]  ;;  %s1787_s30 = scalar_lea.vmem %s1209_s29, 32  ;;  %p1792_p1 = scmp.lt.s32.totalorder %s1209_s29, %s1209_s29 }
  0x13   :  { %v1237_v33 = vld [vmem:[%s2315_s1 + $0xa0] sm:$0xff]  ;;  %v37_v40 = vld [vmem:[%s2314_s0 + $0x11] sm:$0xff]  ;;  %v1692_v42 = vpack.c.bf16 %v1240_v39, %v1239_v38  ;;  %v1242_v44 = vld [vmem:[%s2315_s1 + $0xc8] sm:$0xff]  ;;  %p1788_p0 = scmp.ne.s32.totalorder %s1209_s29, %s1787_s30  ;;  %p1793_p2 = scmp.lt.s32.totalorder %s1787_s30, %s1787_s30 }
  0x14   :  { %1422 = vmatpush3.msra.mxu0 %v1224_v26  ;;  %v1689_v37 = vpack.c.bf16 %v1238_v34, %v1237_v33  ;;  %v23_v41 = vld [vmem:[%s2314_s0 + $0x10] sm:$0xff]  ;;  %v1241_v43 = vld [vmem:[%s2315_s1 + $0xc0] sm:$0xff]  ;;  %v24_v46 = vld [vmem:[%s2314_s0 + $0x18] sm:$0xff] }
  0x15   :  { %1455 = vmatpush3.msra.mxu1 %v34_v29  ;;  %1424 = vmatmul.mubr.msk.f32.vlgmr.msra.gmra.mrb[0].mxu0 %vm50_vm1, %v35_v30  ;;  %v38_v45 = vld [vmem:[%s2314_s0 + $0x19] sm:$0xff]  ;;  %v1695_v47 = vpack.c.bf16 %v1242_v44, %v1241_v43  ;;  %v39_v48 = vld [vmem:[%s2314_s0 + $0x21] sm:$0x3]  ;;  %v1243_v50 = vld [vmem:[%s2315_s1 + $0xd0] sm:$0xff]  ;;  %p1794_p3 = por %p1793_p2, %p1792_p1 }
  0x16   :  { %1457 = vmatmul.mubr.msk.f32.vlgmr.msra.gmra.mrb[0].mxu1 %vm50_vm1, %v21_v31  ;;  %1685 = vmatprep.subr.bf16.mxu0 %v1811_v3  ;;  %v25_v49 = vld [vmem:[%s2314_s0 + $0x20] sm:$0x3]  ;;  %v261_v51 = vld [vmem:[%s2314_s0 + $0x2] sm:$0xff]  ;;  %v262_v52 = vld [vmem:[%s2314_s0 + $0xa] sm:$0xff] }
  0x17   :  { %1426 = vmatprep.mubr.msk.f32.mxu0 %vm1812_vm0, %v1813_v11  ;;  %1459 = vmatprep.mubr.msk.f32.mxu1 %vm1812_vm0, %v1813_v11  ;;  %v263_v53 = vld [vmem:[%s2314_s0 + $0x12] sm:$0xff]  ;;  %v264_v54 = vld [vmem:[%s2314_s0 + $0x1a] sm:$0xff]  ;;  %v265_v55 = vld [vmem:[%s2314_s0 + $0x22] sm:$0x3]  ;;  %p1795_p4 = pnand %p1794_p3, %p1788_p0 }
  0x18   :  { %1687 = vmatpush3.bf16.msra.mxu0 %v1686_v32  ;;  %1697 = vmatprep.subr.bf16.mxu1 %v1811_v3  ;;  %v1249_v22 = vld [vmem:[%s2318_s4] ss:$0 sm:$0xff] }
  0x19   :  { %1427 = vmatmul.mubr.msk.f32.gmra.mrb[2].mxu0 %vm50_vm1, %v36_v35  ;;  %1688 = vmatprep.subr.bf16.mxu0 %v1811_v3 }
  0x1a   :  { %1460 = vmatmul.mubr.msk.f32.gmra.mrb[2].mxu1 %vm50_vm1, %v22_v36  ;;  %1429 = vmatprep.mubr.msk.f32.mxu0 %vm1812_vm0, %v1813_v11 }
  0x1b   :  { %1462 = vmatprep.mubr.msk.f32.mxu1 %vm1812_vm0, %v1813_v11 }
  0x1c   :  { %1690 = vmatpush3.bf16.msra.mxu0 %v1689_v37 }
  0x1d   :  { %1430 = vmatmul.mubr.msk.f32.gmra.mrb[4].mxu0 %vm50_vm1, %v37_v40  ;;  %1691 = vmatprep.subr.bf16.mxu0 %v1811_v3 }
  0x1e   :  { %1463 = vmatmul.mubr.msk.f32.gmra.mrb[4].mxu1 %vm50_vm1, %v23_v41  ;;  %1432 = vmatprep.mubr.msk.f32.mxu0 %vm1812_vm0, %v1813_v11 }
  0x1f   :  { %1465 = vmatprep.mubr.msk.f32.mxu1 %vm1812_vm0, %v1813_v11 }
  0x20   :  { %1693 = vmatpush3.bf16.msra.mxu0 %v1692_v42 }
  0x21   :  { %1433 = vmatmul.mubr.msk.f32.gmra.mrb[6].mxu0 %vm50_vm1, %v38_v45  ;;  %1694 = vmatprep.subr.bf16.mxu0 %v1811_v3 }
  0x22   :  { %1466 = vmatmul.mubr.msk.f32.gmra.mrb[6].mxu1 %vm50_vm1, %v24_v46  ;;  %1435 = vmatprep.mubr.msk.f32.mxu0 %vm1812_vm0, %v1813_v11 }
  0x23   :  { %1468 = vmatprep.mubr.msk.f32.mxu1 %vm1812_vm0, %v1813_v11 }
  0x24   :  { %1696 = vmatpush3.bf16.msra.mxu0 %v1695_v47  ;;  %v426_v47 = vlaneseq }
  0x25   :  { %1436 = vmatmul.mubr.msk.f32.gmra.mrb[8].mxu0 %vm50_vm1, %v39_v48  ;;  %1487 = vmatprep.subr.mxu0 %v1813_v11 }
  0x26   :  { %1469 = vmatmul.mubr.msk.f32.gmra.mrb[8].mxu1 %vm50_vm1, %v25_v49  ;;  %1489 = vmatprep.mubr.msk.f32.mxu0 %vm1812_vm0, %v1813_v11  ;;  %v2041_v48 = vshrl.u32 %v426_v47, 7 }
  0x27   :  { %1514 = vmatprep.mubr.msk.f32.mxu1 %vm1812_vm0, %v1813_v11 }
  0x28   :  { %1488 = vmatpush3.msra.mxu0 %v1243_v50  ;;  %v2044_v49 = vadd.s32 8, %v2041_v48  ;;  %vm432_vm2 = vcmp.ge.s32.totalorder %v2041_v48, 1 }
  0x29   :  { %1490 = vmatmul.mubr.msk.f32.vlgmr.msra.gmra.mrb[10].mxu0 %vm50_vm1, %v261_v51  ;;  %1733 = vmatprep.subr.bf16.mxu0 %v1811_v3 }
  0x2a   :  { %1492 = vmatprep.mubr.msk.f32.mxu0 %vm1812_vm0, %v1813_v11  ;;  %v1254_v50 = vadd.s32 4294967285, %v2044_v49  ;;  %vm436_vm4 = vcmp.lt.s32.totalorder %v2044_v49, 9  ;;  %vm475_vm6 = vcmp.ge.s32.totalorder %v2044_v49, 11 }
  0x2d   :  { %1493 = vmatmul.mubr.msk.f32.gmra.mrb[12].mxu0 %vm50_vm1, %v262_v52 }
  0x2e   :  { %1495 = vmatprep.mubr.msk.f32.mxu0 %vm1812_vm0, %v1813_v11 }
  0x31   :  { %1496 = vmatmul.mubr.msk.f32.gmra.mrb[14].mxu0 %vm50_vm1, %v263_v53 }
  0x32   :  { %1498 = vmatprep.mubr.msk.f32.mxu0 %vm1812_vm0, %v1813_v11 }
  0x35   :  { %1499 = vmatmul.mubr.msk.f32.gmra.mrb[16].mxu0 %vm50_vm1, %v264_v54  ;;  %v1250_v54 = vadd.s32 4294967295, %v2041_v48 }
  0x36   :  { %1501 = vmatprep.mubr.msk.f32.mxu0 %vm1812_vm0, %v1813_v11 }
  0x39   :  { %1502 = vmatmul.mubr.msk.f32.gmra.mrb[18].mxu0 %vm50_vm1, %v265_v55  ;;  %v1251_v55 = vadd.s32 4294967295, %v2044_v49 }
  0x3a   :  { %1608 = vmatprep.mubr.msk.f32.mxu0 %vm1812_vm0, %v1813_v11 }
  0xe8   :  { %v132_v56 = vpop.f32.mrb[0].mxu0 }
  0xe9   :  { %v237_v57 = vpop.f32.mrb[0].mxu1  ;;  %v1425_v58 = vpop.f32.mrb[1].mxu0 }
  0xea   :  { %v238_v59 = vadd.f32 %v237_v57, %v132_v56  ;;  %v1458_v60 = vpop.f32.mrb[1].mxu1  ;;  %v487_v58 = vmul.u32 2, %v1254_v50  ;;  %v1284_v50 = vld [vmem:[%s2316_s2 + $0xb0] sm:$0xff] }
  0xec   :  { %v137_v61 = vpop.f32.mrb[2].mxu0 }
  0xed   :  { %v242_v62 = vpop.f32.mrb[2].mxu1  ;;  %v1428_v63 = vpop.f32.mrb[3].mxu0 }
  0xee   :  { %v243_v0 = vadd.f32 %v242_v62, %v137_v61  ;;  %v1461_v1 = vpop.f32.mrb[3].mxu1  ;;  %v2052_v61 = vand.u32 127, %v426_v47  ;;  %v444_v62 = vmul.u32 2, %v1250_v54  ;;  %v445_v63 = vmul.u32 2, %v1251_v55  ;;  %v1271_v47 = vld [vmem:[%s2316_s2 + $0x78] sm:$0xff] }
  0xf0   :  { %v142_v2 = vpop.f32.mrb[4].mxu0  ;;  %vm447_vm3 = vcmp.eq.s32.totalorder %v2052_v61, %v444_v62  ;;  %vm448_vm5 = vcmp.eq.s32.totalorder %v2052_v61, %v445_v63 }
  0xf1   :  { %v247_v4 = vpop.f32.mrb[4].mxu1  ;;  %v1431_v5 = vpop.f32.mrb[5].mxu0  ;;  %vm450_vm8 = vmand %vm432_vm2, %vm447_vm3 }
  0xf2   :  { %v248_v6 = vadd.f32 %v247_v4, %v142_v2  ;;  %v1464_v7 = vpop.f32.mrb[5].mxu1  ;;  %vm451_vm9 = vmand %vm436_vm4, %vm448_vm5 }
  0xf4   :  { %v147_v8 = vpop.f32.mrb[6].mxu0 }
  0xf5   :  { %v252_v9 = vpop.f32.mrb[6].mxu1  ;;  %v1434_v10 = vpop.f32.mrb[7].mxu0 }
  0xf6   :  { %v253_v12 = vadd.f32 %v252_v9, %v147_v8  ;;  %v1467_v13 = vpop.f32.mrb[7].mxu1 }
  0xf7   :  { %v453_v13 = vsel %vm450_vm8, 1.0, %v1813_v11 }
  0xf8   :  { %v152_v14 = vpop.f32.mrb[8].mxu0 }
  0xf9   :  { %v257_v15 = vpop.f32.mrb[8].mxu1  ;;  %v1437_v16 = vpop.f32.mrb[9].mxu0 }
  0xfa   :  { %v258_v17 = vadd.f32 %v257_v15, %v152_v14  ;;  %v1470_v18 = vpop.f32.mrb[9].mxu1  ;;  %v454_v15 = vsel %vm451_vm9, 1.0, %v1813_v11 }
  0xfb   :  { %v460_v18 = vadd.s32 1, %v445_v63  ;;  %v705_v63 = vld [vmem:[%s2316_s2] sm:$0xff] }
  0xfc   :  { %v357_v19 = vpop.f32.mrb[10].mxu0 }
  0xfd   :  { %v381_v20 = vadd.f32 %v357_v19, %v238_v59  ;;  %v1491_v21 = vpop.f32.mrb[11].mxu0  ;;  %v2050_v59 = vadd.s32 16, %v2041_v48  ;;  %vm463_vm3 = vcmp.eq.s32.totalorder %v2052_v61, %v460_v18 }
  0xfe   :  { %vm466_vm8 = vmand %vm436_vm4, %vm463_vm3  ;;  %vm1029_vm3 = vcmp.lt.s32.totalorder %v2052_v61, 18 }
  0xff   :  { %v391_v24 = vadd.f32 %v1249_v22, %v381_v20  ;;  %v1255_v1 = vadd.s32 4294967285, %v2050_v59  ;;  %vm479_vm13 = vcmp.lt.s32.totalorder %v2050_v59, 19 }
 0x100   :  { %v362_v23 = vpop.f32.mrb[12].mxu0 }
 0x101   :  { %v382_v25 = vadd.f32 %v362_v23, %v243_v0  ;;  %v1494_v26 = vpop.f32.mrb[13].mxu0  ;;  %v396_v29 = vmax.f32 %v391_v24, 0.0  ;;  %v490_v0 = vadd.s32 18, %v487_v58  ;;  %v488_v8 = vmul.u32 2, %v1255_v1 }
 0x102   :  { %v469_v24 = vsel %vm466_vm8, 1.0, %v1813_v11  ;;  %vm1033_vm8 = vcmask 146432  }
 0x103   :  { %v392_v27 = vadd.f32 %v1249_v22, %v382_v25  ;;  %vm493_vm7 = vcmp.eq.s32.totalorder %v2052_v61, %v490_v0  ;;  %v505_v19 = vadd.s32 1, %v490_v0  ;;  %v706_v0 = vld [vmem:[%s2316_s2 + $0x8] sm:$0xff] }
 0x104   :  { %v367_v28 = vpop.f32.mrb[14].mxu0  ;;  %vm496_vm10 = vmand %vm475_vm6, %vm493_vm7 }
 0x105   :  { %v397_v30 = vmax.f32 %v392_v27, 0.0  ;;  %v383_v31 = vadd.f32 %v367_v28, %v248_v6  ;;  %v1497_v32 = vpop.f32.mrb[15].mxu0  ;;  %v499_v16 = vsel %vm496_vm10, 1.0, %v1813_v11  ;;  %vm508_vm5 = vcmp.eq.s32.totalorder %v2052_v61, %v505_v19  ;;  %v1264_v28 = vld [vmem:[%s2316_s2 + $0x40] sm:$0xff] }
 0x106   :  { %v502_v20 = vadd.f32 %v499_v16, %v454_v15  ;;  %vm511_vm9 = vmand %vm475_vm6, %vm508_vm5  ;;  %v1279_v32 = vld [vmem:[%s2316_s2 + $0x88] sm:$0xff]  ;;  %vm725_vm6 = vcmask 1046528   ;;  %vm731_vm10 = vcmask 523264  }
 0x107   :  { %v1777_v33 = vpack.i.bf16 %v397_v30, %v396_v29  ;;  %v393_v35 = vadd.f32 %v1249_v22, %v383_v31  ;;  %v514_v25 = vsel %vm511_vm9, 1.0, %v1813_v11  ;;  %v1278_v31 = vld [vmem:[%s2316_s2 + $0x80] sm:$0xff] }
 0x108   :  { %v372_v34 = vpop.f32.mrb[16].mxu0  ;;  %v517_v26 = vadd.f32 %v514_v25, %v469_v24 }
 0x109   :  { %v384_v36 = vadd.f32 %v372_v34, %v253_v12  ;;  %v1500_v37 = vpop.f32.mrb[17].mxu0  ;;  %1778 = vrot.lane.b32.xlu0 %v1777_v33, %s1814_s27  ;;  %v398_v40 = vmax.f32 %v393_v35, 0.0  ;;  %v491_v12 = vadd.s32 18, %v488_v8  ;;  %v1734_v33 = vpack.c.bf16 %v1279_v32, %v1278_v31  ;;  %v1266_v34 = vld [vmem:[%s2316_s2 + $0x50] sm:$0xff]  ;;  %v1267_v35 = vld [vmem:[%s2316_s2 + $0x58] sm:$0xff] }
 0x10a   :  { %v1280_v37 = vld [vmem:[%s2316_s2 + $0x90] sm:$0xff] }
 0x10b   :  { %v394_v38 = vadd.f32 %v1249_v22, %v384_v36  ;;  %vm494_vm14 = vcmp.eq.s32.totalorder %v2052_v61, %v491_v12  ;;  %1735 = vmatpush3.bf16.msra.mxu0 %v1734_v33  ;;  %v1713_v36 = vpack.c.bf16 %v1267_v35, %v1266_v34  ;;  %v1112_v31 = vld [vmem:[%s2317_s3 + $0x10] sm:$0xff]  ;;  %v1113_v33 = vld [vmem:[%s2317_s3 + $0x18] sm:$0xff]  ;;  %v1114_v35 = vld [vmem:[%s2317_s3 + $0x20] sm:$0xff] }
 0x10c   :  { %v377_v39 = vpop.f32.mrb[18].mxu0  ;;  %vm497_vm1 = vmand %vm479_vm13, %vm494_vm14  ;;  %1736 = vmatprep.subr.bf16.mxu0 %v1811_v3  ;;  %v1752_v34 = vpack.c.bf16 %v1113_v33, %v1112_v31  ;;  %vm1019_vm14 = vcmp.eq.s32.totalorder %v2041_v48, 0 }
 0x10d   :  { %v399_v41 = vmax.f32 %v394_v38, 0.0  ;;  %v385_v42 = vadd.f32 %v377_v39, %v258_v17  ;;  %v1503_v43 = vpop.f32.mrb[19].mxu0  ;;  %v459_v17 = vadd.s32 1, %v444_v62  ;;  %v500_v21 = vsel %vm497_vm1, 1.0, %v1813_v11  ;;  %v1281_v38 = vld [vmem:[%s2316_s2 + $0x98] sm:$0xff] }
 0x10e   :  { %v1737_v39 = vpack.c.bf16 %v1281_v38, %v1280_v37  ;;  %v1282_v43 = vld [vmem:[%s2316_s2 + $0xa0] sm:$0xff]  ;;  %v1116_v38 = vld [vmem:[%s2317_s3 + $0x30] sm:$0xff] }
 0x10f   :  { %v1782_v44 = vpack.i.bf16 %v399_v41, %v398_v40  ;;  %v395_v45 = vadd.f32 %v1249_v22, %v385_v42  ;;  %vm462_vm15 = vcmp.eq.s32.totalorder %v2052_v61, %v459_v17  ;;  %v506_v22 = vadd.s32 1, %v491_v12  ;;  %v707_v12 = vld [vmem:[%s2316_s2 + $0x10] sm:$0xff] }
 0x110   :  { %vm465_vm7 = vmand %vm432_vm2, %vm462_vm15  ;;  %1738 = vmatpush3.bf16.msra.mxu0 %v1737_v39  ;;  %v1117_v39 = vld [vmem:[%s2317_s3 + $0x38] sm:$0xff]  ;;  %vm1022_vm15 = vcmp.lt.s32.totalorder %v2052_v61, 8 }
 0x111   :  { %1783 = vrot.lane.b32.xlu0 %v1782_v44, %s1814_s27  ;;  %v400_v46 = vmax.f32 %v395_v45, 0.0  ;;  %v468_v23 = vsel %vm465_vm7, 1.0, %v1813_v11  ;;  %vm509_vm2 = vcmp.eq.s32.totalorder %v2052_v61, %v506_v22  ;;  %1739 = vmatprep.subr.bf16.mxu0 %v1811_v3  ;;  %v1283_v44 = vld [vmem:[%s2316_s2 + $0xa8] sm:$0xff]  ;;  %vm1023_vm5 = vmand %vm1019_vm14, %vm1022_vm15 }
 0x112   :  { %vm512_vm4 = vmand %vm479_vm13, %vm509_vm2  ;;  %v1740_v45 = vpack.c.bf16 %v1283_v44, %v1282_v43  ;;  %v710_v22 = vld [vmem:[%s2316_s2 + $0x28] sm:$0xff]  ;;  %v1120_v44 = vld [vmem:[%s2317_s3 + $0x50] sm:$0xff]  ;;  %vm1027_vm13 = vcmp.ge.s32.totalorder %v2052_v61, 10 }
 0x113   :  { %414 = vrot.lane.b32.xlu1 %v400_v46, %s1814_s27  ;;  %v515_v27 = vsel %vm512_vm4, 1.0, %v1813_v11 }
 0x114   :  { %1741 = vmatpush3.bf16.msra.mxu0 %v1740_v45  ;;  %v1121_v45 = vld [vmem:[%s2317_s3 + $0x58] sm:$0xff] }
 0x115   :  { %1742 = vmatprep.subr.bf16.mxu0 %v1811_v3 }
 0x17b   :  { %v1779_v51 = vpop.permute.xlu0 %1778 }
 0x17c   :  { %v1781_v52 = vunpack.i.h.bf16 %v1779_v51  ;;  %v1780_v53 = vunpack.i.l.bf16 %v1779_v51  ;;  %v1285_v51 = vld [vmem:[%s2316_s2 + $0xb8] sm:$0xff] }
 0x17e   :  { %v422_v56 = vmax.f32 %v397_v30, %v1781_v52  ;;  %v421_v57 = vmax.f32 %v396_v29, %v1780_v53  ;;  %v1265_v29 = vld [vmem:[%s2316_s2 + $0x48] sm:$0xff]  ;;  %v1743_v52 = vpack.c.bf16 %v1285_v51, %v1284_v50  ;;  %v1124_v51 = vld [vmem:[%s2317_s3 + $0x70] sm:$0xff] }
 0x17f   :  { %v1710_v30 = vpack.c.bf16 %v1265_v29, %v1264_v28  ;;  %v1110_v29 = vld [vmem:[%s2317_s3] sm:$0xff] }
 0x180   :  { %v1698_v60 = vpack.c.bf16 %v422_v56, %v421_v57  ;;  %1744 = vmatpush3.bf16.msra.mxu0 %v1743_v52  ;;  %v1125_v52 = vld [vmem:[%s2317_s3 + $0x78] sm:$0xff] }
 0x181   :  { %1748 = vmatprep.subr.bf16.mxu0 %v1811_v3 }
 0x182   :  { %1699 = vmatpush3.bf16.msra.mxu1 %v1698_v60 }
 0x183   :  { %v1784_v2 = vpop.permute.xlu0 %1783  ;;  %1700 = vmatprep.subr.bf16.mxu1 %v1811_v3 }
 0x184   :  { %v1786_v4 = vunpack.i.h.bf16 %v1784_v2  ;;  %v1785_v5 = vunpack.i.l.bf16 %v1784_v2 }
 0x185   :  { %v415_v10 = vpop.permute.xlu1 %414 }
 0x186   :  { %v424_v6 = vmax.f32 %v399_v41, %v1786_v4  ;;  %v423_v7 = vmax.f32 %v398_v40, %v1785_v5  ;;  %v425_v14 = vmax.f32 %v400_v46, %v415_v10  ;;  %v1268_v40 = vld [vmem:[%s2316_s2 + $0x60] sm:$0xff]  ;;  %v1269_v41 = vld [vmem:[%s2316_s2 + $0x68] sm:$0xff]  ;;  %v1270_v46 = vld [vmem:[%s2316_s2 + $0x70] sm:$0xff]  ;;  %v1722_v5 = vpack.c.bf16 %v706_v0, %v705_v63 }
 0x187   :  { %v1716_v42 = vpack.c.bf16 %v1269_v41, %v1268_v40  ;;  %v1719_v49 = vpack.c.bf16 %v1271_v47, %v1270_v46  ;;  %v1758_v40 = vpack.c.bf16 %v1117_v39, %v1116_v38  ;;  %v1118_v41 = vld [vmem:[%s2317_s3 + $0x40] sm:$0xff]  ;;  %v1764_v46 = vpack.c.bf16 %v1121_v45, %v1120_v44 }
 0x188   :  { %v1701_v9 = vpack.c.bf16 %v424_v6, %v423_v7  ;;  %v1122_v47 = vld [vmem:[%s2317_s3 + $0x60] sm:$0xff] }
 0x18a   :  { %1702 = vmatpush3.bf16.msra.mxu1 %v1701_v9 }
 0x18b   :  { %1512 = vmatprep.subr.mxu1 %v1813_v11 }
 0x18e   :  { %1513 = vmatpush3.msk.msra.mxu1 %vm529_vm11, %v425_v14 }
 0x18f   :  { %1515 = vmatmul.mubr.msk.f32.vlgmr.msra.gmra.mrb[10].mxu1 %vm519_vm12, %v453_v13  ;;  %1703 = vmatprep.subr.bf16.mxu1 %v1811_v3  ;;  %v708_v13 = vld [vmem:[%s2316_s2 + $0x18] sm:$0xff] }
 0x190   :  { %1705 = vmatpush3.bf16.msra.mxu1 %v1698_v60  ;;  %1517 = vmatprep.mubr.msk.f32.mxu1 %vm1812_vm0, %v1813_v11 }
 0x191   :  { %1706 = vmatprep.subr.bf16.mxu1 %v1811_v3 }
 0x193   :  { %1518 = vmatmul.mubr.msk.f32.gmra.mrb[12].mxu1 %vm519_vm12, %v502_v20  ;;  %v1725_v20 = vpack.c.bf16 %v708_v13, %v707_v12 }
 0x194   :  { %1708 = vmatpush3.bf16.msra.mxu1 %v1701_v9  ;;  %1520 = vmatprep.mubr.msk.f32.mxu1 %vm1812_vm0, %v1813_v11 }
 0x195   :  { %1531 = vmatprep.subr.mxu1 %v1813_v11 }
 0x197   :  { %1521 = vmatmul.mubr.msk.f32.gmra.mrb[14].mxu1 %vm519_vm12, %v500_v21  ;;  %v709_v21 = vld [vmem:[%s2316_s2 + $0x20] sm:$0xff] }
 0x198   :  { %1532 = vmatpush3.msk.msra.mxu1 %vm529_vm11, %v425_v14  ;;  %1533 = vmatprep.mubr.msk.f32.mxu1 %vm1812_vm0, %v1813_v11  ;;  %v1728_v25 = vpack.c.bf16 %v710_v22, %v709_v21 }
 0x199   :  { %1709 = vmatprep.subr.bf16.mxu1 %v1811_v3 }
 0x19b   :  { %1534 = vmatmul.mubr.msk.f32.vlgmr.msra.gmra.mrb[16].mxu1 %vm519_vm12, %v468_v23 }
 0x19c   :  { %1536 = vmatprep.mubr.msk.f32.mxu1 %vm1812_vm0, %v1813_v11  ;;  %1711 = vmatpush3.bf16.msra.mxu1 %v1710_v30  ;;  %v1111_v30 = vld [vmem:[%s2317_s3 + $0x8] sm:$0xff] }
 0x19d   :  { %1712 = vmatprep.subr.bf16.mxu1 %v1811_v3  ;;  %v1749_v32 = vpack.c.bf16 %v1111_v30, %v1110_v29 }
 0x19f   :  { %1537 = vmatmul.mubr.msk.f32.gmra.mrb[18].mxu1 %vm519_vm12, %v517_v26  ;;  %v711_v26 = vld [vmem:[%s2316_s2 + $0x30] sm:$0xff] }
 0x1a0   :  { %1539 = vmatprep.mubr.msk.f32.mxu1 %vm1812_vm0, %v1813_v11  ;;  %1714 = vmatpush3.bf16.msra.mxu1 %v1713_v36  ;;  %v1115_v36 = vld [vmem:[%s2317_s3 + $0x28] sm:$0xff] }
 0x1a1   :  { %1715 = vmatprep.subr.bf16.mxu1 %v1811_v3  ;;  %v1755_v37 = vpack.c.bf16 %v1115_v36, %v1114_v35 }
 0x1a3   :  { %1540 = vmatmul.mubr.msk.f32.gmra.mrb[20].mxu1 %vm519_vm12, %v515_v27  ;;  %vm913_vm12 = vcmask 1045504   ;;  %v712_v27 = vld [vmem:[%s2316_s2 + $0x38] sm:$0xff] }
 0x1a4   :  { %1558 = vmatprep.mubr.msk.f32.mxu1 %vm1812_vm0, %v1813_v11  ;;  %1717 = vmatpush3.bf16.msra.mxu1 %v1716_v42  ;;  %v1731_v28 = vpack.c.bf16 %v712_v27, %v711_v26  ;;  %v1119_v42 = vld [vmem:[%s2317_s3 + $0x48] sm:$0xff]  ;;  %v1292_v27 = vld [vmem:[%s2318_s4 + $0x2] ss:$0 sm:$0xff] }
 0x1a5   :  { %1718 = vmatprep.subr.bf16.mxu1 %v1811_v3  ;;  %v1761_v43 = vpack.c.bf16 %v1119_v42, %v1118_v41 }
 0x1a8   :  { %1720 = vmatpush3.bf16.msra.mxu1 %v1719_v49  ;;  %v1123_v49 = vld [vmem:[%s2317_s3 + $0x68] sm:$0xff] }
 0x1a9   :  { %1721 = vmatprep.subr.bf16.mxu1 %v1811_v3  ;;  %v1767_v50 = vpack.c.bf16 %v1123_v49, %v1122_v47 }
 0x262   :  { %v599_v53 = vpop.f32.mrb[10].mxu1 }
 0x263   :  { %v1516_v54 = vpop.f32.mrb[11].mxu1 }
 0x266   :  { %v604_v55 = vpop.f32.mrb[12].mxu1 }
 0x267   :  { %v1519_v56 = vpop.f32.mrb[13].mxu1 }
 0x26a   :  { %v609_v57 = vpop.f32.mrb[14].mxu1 }
 0x26b   :  { %v1522_v58 = vpop.f32.mrb[15].mxu1 }
 0x26e   :  { %v688_v59 = vpop.f32.mrb[16].mxu1 }
 0x26f   :  { %v702_v60 = vmax.f32 %v599_v53, %v688_v59  ;;  %v1535_v62 = vpop.f32.mrb[17].mxu1  ;;  %v1770_v53 = vpack.c.bf16 %v1125_v52, %v1124_v51 }
 0x271   :  { %v726_v6 = vrot.slane %v702_v60, 1  ;;  %v914_v7 = vrot.slane %v702_v60, 2 }
 0x272   :  { %v693_v1 = vpop.f32.mrb[18].mxu1 }
 0x273   :  { %v703_v2 = vmax.f32 %v604_v55, %v693_v1  ;;  %v1538_v4 = vpop.f32.mrb[19].mxu1 }
 0x275   :  { %v727_v8 = vrot.slane %v703_v2, 1  ;;  %v915_v9 = vrot.slane %v703_v2, 2 }
 0x276   :  { %v698_v10 = vpop.f32.mrb[20].mxu1 }
 0x277   :  { %v704_v14 = vmax.f32 %v609_v57, %v698_v10  ;;  %v728_v15 = vsel %vm725_vm6, %v726_v6, %v727_v8  ;;  %v916_v16 = vsel %vm913_vm12, %v914_v7, %v915_v9  ;;  %v1541_v17 = vpop.f32.mrb[21].mxu1 }
 0x278   :  { %1559 = vmatmul.mubr.msk.f32.vlgmr.msra.gmra.mrb[22].mxu1 %vm731_vm10, %v728_v15  ;;  %1609 = vmatmul.mubr.msk.f32.vlgmr.msra.gmra.mrb[20].mxu0 %vm731_vm10, %v916_v16 }
 0x279   :  { %v729_v18 = vrot.slane %v704_v14, 1  ;;  %v917_v19 = vrot.slane %v704_v14, 2  ;;  %1723 = vmatpush3.bf16.msra.mxu1 %v1722_v5  ;;  %1561 = vmatprep.mubr.msk.f32.mxu1 %vm1812_vm0, %v1813_v11 }
 0x27a   :  { %1724 = vmatprep.subr.bf16.mxu1 %v1811_v3  ;;  %1611 = vmatprep.mubr.msk.f32.mxu0 %vm1812_vm0, %v1813_v11 }
 0x27b   :  { %v730_v23 = vsel %vm725_vm6, %v727_v8, %v729_v18  ;;  %v918_v24 = vsel %vm913_vm12, %v915_v9, %v917_v19  ;;  %1750 = vmatpush3.bf16.msra.mxu0 %v1749_v32 }
 0x27c   :  { %1562 = vmatmul.mubr.msk.f32.gmra.mrb[24].mxu1 %vm731_vm10, %v730_v23  ;;  %1612 = vmatmul.mubr.msk.f32.gmra.mrb[22].mxu0 %vm731_vm10, %v918_v24 }
 0x27d   :  { %1726 = vmatpush3.bf16.msra.mxu1 %v1725_v20  ;;  %1564 = vmatprep.mubr.msk.f32.mxu1 %vm1812_vm0, %v1813_v11 }
 0x27e   :  { %1727 = vmatprep.subr.bf16.mxu1 %v1811_v3  ;;  %1614 = vmatprep.mubr.msk.f32.mxu0 %vm1812_vm0, %v1813_v11 }
 0x27f   :  { %1751 = vmatprep.subr.bf16.mxu0 %v1811_v3 }
 0x280   :  { %1565 = vmatmul.mubr.msk.f32.gmra.mrb[26].mxu1 %vm731_vm10, %v729_v18  ;;  %1615 = vmatmul.mubr.msk.f32.gmra.mrb[24].mxu0 %vm731_vm10, %v917_v19 }
 0x281   :  { %1729 = vmatpush3.bf16.msra.mxu1 %v1728_v25  ;;  %1583 = vmatprep.mubr.msk.f32.mxu1 %vm1812_vm0, %v1813_v11 }
 0x282   :  { %1730 = vmatprep.subr.bf16.mxu1 %v1811_v3  ;;  %1658 = vmatprep.mubr.msk.f32.mxu0 %vm1812_vm0, %v1813_v11 }
 0x283   :  { %1753 = vmatpush3.bf16.msra.mxu0 %v1752_v34 }
 0x284   :  { %1754 = vmatprep.subr.bf16.mxu0 %v1811_v3 }
 0x285   :  { %1732 = vmatpush3.bf16.msra.mxu1 %v1731_v28 }
 0x286   :  { %1745 = vmatprep.subr.bf16.mxu1 %v1811_v3 }
 0x287   :  { %1756 = vmatpush3.bf16.msra.mxu0 %v1755_v37 }
 0x288   :  { %1584 = vmatmul.mubr.msk.f32.vlgmr.msra.gmra.mrb[28].mxu1 %vm731_vm10, %v702_v60  ;;  %1757 = vmatprep.subr.bf16.mxu0 %v1811_v3 }
 0x289   :  { %1586 = vmatprep.mubr.msk.f32.mxu1 %vm1812_vm0, %v1813_v11 }
 0x28b   :  { %1759 = vmatpush3.bf16.msra.mxu0 %v1758_v40 }
 0x28c   :  { %1587 = vmatmul.mubr.msk.f32.gmra.mrb[30].mxu1 %vm731_vm10, %v703_v2  ;;  %1760 = vmatprep.subr.bf16.mxu0 %v1811_v3 }
 0x28d   :  { %1589 = vmatprep.mubr.msk.f32.mxu1 %vm1812_vm0, %v1813_v11 }
 0x28f   :  { %1762 = vmatpush3.bf16.msra.mxu0 %v1761_v43 }
 0x290   :  { %1590 = vmatmul.mubr.msk.f32.gmra.mrb[32].mxu1 %vm731_vm10, %v704_v14  ;;  %1763 = vmatprep.subr.bf16.mxu0 %v1811_v3 }
 0x291   :  { %1623 = vmatprep.mubr.msk.f32.mxu1 %vm1812_vm0, %v1813_v11  ;;  %vm1026_vm0 = vcmp.eq.s32.totalorder %v2041_v48, 1  ;;  %v1024_v48 = vsel %vm1023_vm5, 1.0, %v1813_v11 }
 0x292   :  { %vm1028_vm1 = vmand %vm1026_vm0, %vm1027_vm13 }
 0x293   :  { %1765 = vmatpush3.bf16.msra.mxu0 %v1764_v46  ;;  %vm1030_vm7 = vmand %vm1028_vm1, %vm1029_vm3 }
 0x294   :  { %1766 = vmatprep.subr.bf16.mxu0 %v1811_v3  ;;  %v1031_v23 = vsel %vm1030_vm7, 1.0, %v1813_v11 }
 0x295   :  { %v1032_v24 = vadd.f32 %v1031_v23, %v1024_v48 }
 0x297   :  { %1768 = vmatpush3.bf16.msra.mxu0 %v1767_v50 }
 0x298   :  { %1769 = vmatprep.subr.bf16.mxu0 %v1811_v3  ;;  %v1289_v3 = vld [vmem:[%s2318_s4 + $0x1] ss:$0 sm:$0xff] }
 0x29b   :  { %1771 = vmatpush3.bf16.msra.mxu0 %v1770_v53 }
 0x34b   :  { %v804_v54 = vpop.f32.mrb[22].mxu1  ;;  %v991_v55 = vpop.f32.mrb[20].mxu0 }
 0x34c   :  { %v1560_v56 = vpop.f32.mrb[23].mxu1  ;;  %v1610_v57 = vpop.f32.mrb[21].mxu0 }
 0x34f   :  { %v809_v58 = vpop.f32.mrb[24].mxu1  ;;  %v996_v59 = vpop.f32.mrb[22].mxu0 }
 0x350   :  { %v1563_v60 = vpop.f32.mrb[25].mxu1  ;;  %v1613_v62 = vpop.f32.mrb[23].mxu0 }
 0x353   :  { %v814_v63 = vpop.f32.mrb[26].mxu1  ;;  %v1001_v0 = vpop.f32.mrb[24].mxu0 }
 0x354   :  { %v1566_v1 = vpop.f32.mrb[27].mxu1  ;;  %v1616_v2 = vpop.f32.mrb[25].mxu0 }
 0x35b   :  { %v890_v4 = vpop.f32.mrb[28].mxu1 }
 0x35c   :  { %v891_v5 = vadd.f32 %v890_v4, %v804_v54  ;;  %v1585_v6 = vpop.f32.mrb[29].mxu1 }
 0x35e   :  { %v1005_v7 = vadd.f32 %v991_v55, %v891_v5 }
 0x35f   :  { %v895_v8 = vpop.f32.mrb[30].mxu1 }
 0x360   :  { %v896_v9 = vadd.f32 %v895_v8, %v809_v58  ;;  %v1588_v10 = vpop.f32.mrb[31].mxu1  ;;  %v1013_v12 = vadd.f32 %v1289_v3, %v1005_v7 }
 0x362   :  { %v1006_v13 = vadd.f32 %v996_v59, %v896_v9  ;;  %v1016_v18 = vmax.f32 %v1013_v12, 0.0 }
 0x363   :  { %v900_v14 = vpop.f32.mrb[32].mxu1 }
 0x364   :  { %v1014_v15 = vadd.f32 %v1289_v3, %v1006_v13  ;;  %v901_v16 = vadd.f32 %v900_v14, %v814_v63  ;;  %v1591_v17 = vpop.f32.mrb[33].mxu1 }
 0x366   :  { %v1017_v19 = vmax.f32 %v1014_v15, 0.0  ;;  %v1007_v20 = vadd.f32 %v1001_v0, %v901_v16 }
 0x368   :  { %v1746_v21 = vpack.c.bf16 %v1017_v19, %v1016_v18  ;;  %v1015_v22 = vadd.f32 %v1289_v3, %v1007_v20 }
 0x36a   :  { %1747 = vmatpush3.bf16.msra.mxu1 %v1746_v21  ;;  %v1018_v61 = vmax.f32 %v1015_v22, 0.0 }
 0x36b   :  { %1621 = vmatprep.subr.mxu1 %v1813_v11 }
 0x36e   :  { %1622 = vmatpush3.msk.msra.mxu1 %vm529_vm11, %v1018_v61 }
 0x36f   :  { %1624 = vmatmul.mubr.msk.f32.vlgmr.msra.gmra.mrb[34].mxu1 %vm1033_vm8, %v1032_v24 }
 0x442   :  { %v1106_v25 = vpop.f32.mrb[34].mxu1 }
 0x443   :  { %v1625_v26 = vpop.f32.mrb[35].mxu1  ;;  %1659 = vmatmul.mubr.f32.vlgmr.msra.gmra.mrb[26].mxu0 %v1106_v25 }
 0x516   :  { %v1197_v28 = vpop.f32.mrb[26].mxu0 }
 0x517   :  { %v1198_v29 = vadd.f32 %v1292_v27, %v1197_v28  ;;  %v1660_v30 = vpop.f32.mrb[27].mxu0 }
 0x519   :  { %1201 = vst [vmem:[#allocation2] sm:$0x3] %v1198_v29 }
 0x51a   :  { %1798 = shalt.err (!%p1795_p4)
}
 0x51b   :  { %s1799_s8 = scalar_lea.hbm %s2319_s5, 32 }
 0x51c   :  { %p1800_p5 = scmp.ne.s32.totalorder %s2319_s5, %s1799_s8  ;;  %p1803_p6 = scmp.lt.u32.totalorder %s1799_s8, %s2319_s5 }
 0x51e   :  { %p1805_p7 = pnand %p1803_p6, %p1800_p5 }
 0x520   :  { %1808 = shalt.err (!%p1805_p7)
}
 0x521   :  { %1211 = dma.vmem_to_hbm [thread:$0]  %s1209_s29, 32, %s2319_s5, [#allocation3]  }
 0x522   :  { %1809 = dma.done.wait [#allocation3], 32  }
 0x523   :  { %1810 = vsyncadd [#allocation3], 4294967264 }
 0x524   :  { %1215 = vsyncpa [#allocation3], 1 }

</bundles_post_ra>
